<compile_context>
chip_gen: v5e
topology: v5e:2x2
jax: 0.10.0
libtpu: 0.0.40
codegen_flags: <defaults>
</compile_context>

<pallas_src>
import jax
import jax.numpy as jnp
from jax.experimental import pallas as pl
from jax.experimental.pallas import tpu as pltpu


def _round_up(n: int, m: int) -> int:
    return ((n + m - 1) // m) * m


def _make_kernel(x_dim: int):
    """Kernel factory (x_dim is static so layer-1 strategy is chosen at trace)."""

    def kernel(x_ref, w1_ref, w2_ref, w3_ref, wmu_ref, wlv_ref, b_ref, bh_ref,
               mu_ref, lv_ref):
        x = x_ref[...]                                   # (BM, x_dim) f32

        # ---- Layer 1: Linear + ReLU ------------------------------------
        if x_dim <= 8:
            # Tiny-K path on the VPU: avoids an MXU push with K=2.
            acc = x[:, 0:1] * w1_ref[0:1, :]             # (BM,1)*(1,W)->(BM,W)
            for j in range(1, x_dim):
                acc = acc + x[:, j:j + 1] * w1_ref[j:j + 1, :]
        else:
            acc = jnp.dot(x, w1_ref[...], preferred_element_type=jnp.float32)
        h = jnp.maximum(acc + b_ref[0:1, :], 0.0)

        # ---- Layer 2: Linear + ReLU (MXU) ------------------------------
        h = jnp.dot(h, w2_ref[...], preferred_element_type=jnp.float32)
        h = jnp.maximum(h + b_ref[1:2, :], 0.0)

        # ---- Layer 3: Linear + ReLU (MXU) ------------------------------
        h = jnp.dot(h, w3_ref[...], preferred_element_type=jnp.float32)
        h = jnp.maximum(h + b_ref[2:3, :], 0.0)

        # ---- Heads: mu / logvar written directly (narrow, no HBM slab) -
        mu_ref[...] = (jnp.dot(h, wmu_ref[...], preferred_element_type=jnp.float32)
                       + bh_ref[0:1, :])
        lv_ref[...] = (jnp.dot(h, wlv_ref[...], preferred_element_type=jnp.float32)
                       + bh_ref[1:2, :])

    return kernel


def pack_params(params):
    """Zero-pad the hidden width to 128 lanes; pack the three hidden biases."""
    w1 = params["w1"]                       # (x_dim, hidden)
    w2 = params["w2"]                       # (hidden, hidden)
    w3 = params["w3"]
    wmu, bmu = params["wmu"], params["bmu"]  # (hidden, z_dim), (1, z_dim)
    wlv, blv = params["wlv"], params["blv"]

    x_dim, hidden = w1.shape
    z_dim = wmu.shape[1]
    W = _round_up(hidden, 128)              # lane-dense hidden width

    def pad2(a, rows, cols):
        return jnp.pad(a, ((0, rows - a.shape[0]), (0, cols - a.shape[1])))

    packed = dict(
        w1=pad2(w1, x_dim, W),              # (x_dim, W) — K left un-padded
        w2=pad2(w2, W, W),
        w3=pad2(w3, W, W),
        wmu=pad2(wmu, W, z_dim),            # zero rows for padded hidden lanes
        wlv=pad2(wlv, W, z_dim),
        b=jnp.concatenate(
            [pad2(params["b1"], 1, W), pad2(params["b2"], 1, W),
             pad2(params["b3"], 1, W)], axis=0),            # (3, W)
        bh=jnp.concatenate([bmu, blv], axis=0),              # (2, z_dim)
    )
    meta = dict(x_dim=x_dim, z_dim=z_dim, hidden=hidden, W=W)
    return packed, meta


def encoder_forward(x, packed, meta, *, num_blocks=2, max_block_rows=4096):
    """x: (B, x_dim) f32 -> (mu_z, logvar_z), each (B, z_dim) f32."""
    B, x_dim = x.shape
    assert x_dim == meta["x_dim"]
    W, z_dim = meta["W"], meta["z_dim"]

    # Batch tile: aim for `num_blocks` balanced grid steps (2 -> one block per
    # TensorCore on v7x; on v6e/v5e the extra step costs ~0.35 us).  Cap BM so
    # the in-kernel (BM, W) f32 activation temporaries stay comfortably small.
    BM = max(_round_up(pl.cdiv(B, num_blocks), 8), 8)
    BM = min(BM, max_block_rows)
    grid = (pl.cdiv(B, BM),)                # ragged last block handled by Pallas

    def resident(shape):
        # Same block every grid step -> DMA'd once, VMEM-resident.
        return pl.BlockSpec(shape, lambda i: (0, 0))

    mu, logvar = pl.pallas_call(
        _make_kernel(x_dim),
        out_shape=(jax.ShapeDtypeStruct((B, z_dim), jnp.float32),
                   jax.ShapeDtypeStruct((B, z_dim), jnp.float32)),
        grid=grid,
        in_specs=[
            pl.BlockSpec((BM, x_dim), lambda i: (i, 0)),   # x: streamed, unpadded
            resident((x_dim, W)),                          # w1
            resident((W, W)),                              # w2
            resident((W, W)),                              # w3
            resident((W, z_dim)),                          # wmu
            resident((W, z_dim)),                          # wlv
            resident((3, W)),                              # hidden biases
            resident((2, z_dim)),                          # head biases
        ],
        out_specs=(pl.BlockSpec((BM, z_dim), lambda i: (i, 0)),
                   pl.BlockSpec((BM, z_dim), lambda i: (i, 0))),
        compiler_params=pltpu.CompilerParams(
            dimension_semantics=("parallel",)),            # shards across 2 TCs on v7x
    )(x, packed["w1"], packed["w2"], packed["w3"], packed["wmu"],
      packed["wlv"], packed["b"], packed["bh"])

    return mu, logvar


def init_params(key, x_dim=2, z_dim=2, hidden_dim=32):
    """Deterministic init mimicking PyTorch's U(-1/sqrt(fan_in), 1/sqrt(fan_in))."""
    def linear(k, fan_in, fan_out):
        kw, kb = jax.random.split(k)
        bound = 1.0 / jnp.sqrt(fan_in)
        # stored as (in, out) so the kernel computes x @ W
        w = jax.random.uniform(kw, (fan_in, fan_out), jnp.float32, -bound, bound)
        b = jax.random.uniform(kb, (1, fan_out), jnp.float32, -bound, bound)
        return w, b

    keys = jax.random.split(key, 5)
    w1, b1 = linear(keys[0], x_dim, hidden_dim)
    w2, b2 = linear(keys[1], hidden_dim, hidden_dim)
    w3, b3 = linear(keys[2], hidden_dim, hidden_dim)
    wmu, bmu = linear(keys[3], hidden_dim, z_dim)
    wlv, blv = linear(keys[4], hidden_dim, z_dim)
    return dict(w1=w1, b1=b1, w2=w2, b2=b2, w3=w3, b3=b3,
                wmu=wmu, bmu=bmu, wlv=wlv, blv=blv)


def encoder_reference(x, p):
    """Pure-JAX reference (unpadded) for correctness check."""
    h = jnp.maximum(x @ p["w1"] + p["b1"], 0.0)
    h = jnp.maximum(h @ p["w2"] + p["b2"], 0.0)
    h = jnp.maximum(h @ p["w3"] + p["b3"], 0.0)
    return h @ p["wmu"] + p["bmu"], h @ p["wlv"] + p["blv"]


if __name__ == "__main__":
    key = jax.random.PRNGKey(0)
    kx, kx2, kp = jax.random.split(key, 3)

    batch, x_dim, z_dim, hidden_dim = 8, 2, 2, 32
    x = jax.random.normal(kx, (batch, x_dim), dtype=jnp.float32)
    params = init_params(kp, x_dim=x_dim, z_dim=z_dim, hidden_dim=hidden_dim)
    packed, meta = pack_params(params)

    # Small batch: single grid step.
    mu, logvar = encoder_forward(x, packed, meta)
    mu = jax.block_until_ready(mu)
    logvar = jax.block_until_ready(logvar)
    mu_ref, lv_ref = encoder_reference(x, params)
    assert mu.shape == (batch, z_dim) and logvar.shape == (batch, z_dim)
    assert jnp.allclose(mu, mu_ref, atol=1e-5, rtol=1e-5)
    assert jnp.allclose(logvar, lv_ref, atol=1e-5, rtol=1e-5)

    # Larger, non-divisible batch: exercises the 2-step parallel grid with a
    # ragged last block, VMEM-resident weights and narrow (B, z_dim) outputs.
    x2 = jax.random.normal(kx2, (300, x_dim), dtype=jnp.float32)
    mu2, lv2 = encoder_forward(x2, packed, meta, num_blocks=2)
    mu2 = jax.block_until_ready(mu2)
    lv2 = jax.block_until_ready(lv2)
    mu2_ref, lv2_ref = encoder_reference(x2, params)
    assert mu2.shape == (300, z_dim) and lv2.shape == (300, z_dim)
    assert jnp.allclose(mu2, mu2_ref, atol=1e-5, rtol=1e-5)
    assert jnp.allclose(lv2, lv2_ref, atol=1e-5, rtol=1e-5)

    print("KERNEL_OK")
</pallas_src>

<mosaic_0001>
module attributes {stable_mosaic.version = 11 : i64} {
  func.func @kernel(%arg0: i32, %arg1: memref<8x2xf32, #tpu.memory_space<vmem>>, %arg2: memref<2x128xf32, #tpu.memory_space<vmem>>, %arg3: memref<128x128xf32, #tpu.memory_space<vmem>>, %arg4: memref<128x128xf32, #tpu.memory_space<vmem>>, %arg5: memref<128x2xf32, #tpu.memory_space<vmem>>, %arg6: memref<128x2xf32, #tpu.memory_space<vmem>>, %arg7: memref<3x128xf32, #tpu.memory_space<vmem>>, %arg8: memref<2x2xf32, #tpu.memory_space<vmem>>, %arg9: memref<8x2xf32, #tpu.memory_space<vmem>>, %arg10: memref<8x2xf32, #tpu.memory_space<vmem>>) attributes {dimension_semantics = [#tpu.dimension_semantics<parallel>], iteration_bounds = array<i64: 1>, scalar_prefetch = 0 : i64, scratch_operands = 0 : i64, tpu.core_type = #tpu.core_type<tc>, window_params = [{transform_indices = @transform_0, window_bounds = array<i64: 8, 2>}, {pipeline_mode = #tpu.pipeline_mode<synchronous>, transform_indices = @transform_1, window_bounds = array<i64: 2, 128>}, {pipeline_mode = #tpu.pipeline_mode<synchronous>, transform_indices = @transform_2, window_bounds = array<i64: 128, 128>}, {pipeline_mode = #tpu.pipeline_mode<synchronous>, transform_indices = @transform_3, window_bounds = array<i64: 128, 128>}, {pipeline_mode = #tpu.pipeline_mode<synchronous>, transform_indices = @transform_4, window_bounds = array<i64: 128, 2>}, {pipeline_mode = #tpu.pipeline_mode<synchronous>, transform_indices = @transform_5, window_bounds = array<i64: 128, 2>}, {pipeline_mode = #tpu.pipeline_mode<synchronous>, transform_indices = @transform_6, window_bounds = array<i64: 3, 128>}, {pipeline_mode = #tpu.pipeline_mode<synchronous>, transform_indices = @transform_7, window_bounds = array<i64: 2, 2>}, {transform_indices = @transform_8, window_bounds = array<i64: 8, 2>}, {transform_indices = @transform_9, window_bounds = array<i64: 8, 2>}]} {
    %c0 = arith.constant 0 : index
    %c0_0 = arith.constant 0 : index
    %0 = vector.load %arg1[%c0, %c0_0] : memref<8x2xf32, #tpu.memory_space<vmem>>, vector<8x2xf32>
    %1 = vector.extract_strided_slice %0 {offsets = [0, 0], sizes = [8, 1], strides = [1, 1]} : vector<8x2xf32> to vector<8x1xf32>
    %c0_1 = arith.constant 0 : index
    %c0_2 = arith.constant 0 : index
    %2 = vector.load %arg2[%c0_1, %c0_2] : memref<2x128xf32, #tpu.memory_space<vmem>>, vector<1x128xf32>
    %3 = vector.broadcast %1 : vector<8x1xf32> to vector<8x128xf32>
    %4 = vector.broadcast %2 : vector<1x128xf32> to vector<8x128xf32>
    %5 = arith.mulf %3, %4 : vector<8x128xf32>
    %6 = vector.extract_strided_slice %0 {offsets = [0, 1], sizes = [8, 1], strides = [1, 1]} : vector<8x2xf32> to vector<8x1xf32>
    %c1 = arith.constant 1 : index
    %c0_3 = arith.constant 0 : index
    %7 = vector.load %arg2[%c1, %c0_3] : memref<2x128xf32, #tpu.memory_space<vmem>>, vector<1x128xf32>
    %8 = vector.broadcast %6 : vector<8x1xf32> to vector<8x128xf32>
    %9 = vector.broadcast %7 : vector<1x128xf32> to vector<8x128xf32>
    %10 = arith.mulf %8, %9 : vector<8x128xf32>
    %11 = arith.addf %5, %10 : vector<8x128xf32>
    %c0_4 = arith.constant 0 : index
    %c0_5 = arith.constant 0 : index
    %12 = vector.load %arg7[%c0_4, %c0_5] : memref<3x128xf32, #tpu.memory_space<vmem>>, vector<1x128xf32>
    %13 = vector.broadcast %12 : vector<1x128xf32> to vector<8x128xf32>
    %14 = arith.addf %11, %13 : vector<8x128xf32>
    %cst = arith.constant 0.000000e+00 : f32
    %15 = vector.broadcast %cst : f32 to vector<8x128xf32>
    %16 = arith.maximumf %14, %15 : vector<8x128xf32>
    %c0_6 = arith.constant 0 : index
    %c0_7 = arith.constant 0 : index
    %17 = vector.load %arg3[%c0_6, %c0_7] : memref<128x128xf32, #tpu.memory_space<vmem>>, vector<128x128xf32>
    %cst_8 = arith.constant dense<0.000000e+00> : vector<8x128xf32>
    %18 = tpu.matmul %16, %17, %cst_8 {dimension_numbers = #tpu.dot_dimension_numbers<[1], [0], [0], [1], [0, 0, 1, 1], [], []>} : vector<8x128xf32>, vector<128x128xf32>, vector<8x128xf32> -> vector<8x128xf32>
    %c1_9 = arith.constant 1 : index
    %c0_10 = arith.constant 0 : index
    %19 = vector.load %arg7[%c1_9, %c0_10] : memref<3x128xf32, #tpu.memory_space<vmem>>, vector<1x128xf32>
    %20 = vector.broadcast %19 : vector<1x128xf32> to vector<8x128xf32>
    %21 = arith.addf %18, %20 : vector<8x128xf32>
    %cst_11 = arith.constant 0.000000e+00 : f32
    %22 = vector.broadcast %cst_11 : f32 to vector<8x128xf32>
    %23 = arith.maximumf %21, %22 : vector<8x128xf32>
    %c0_12 = arith.constant 0 : index
    %c0_13 = arith.constant 0 : index
    %24 = vector.load %arg4[%c0_12, %c0_13] : memref<128x128xf32, #tpu.memory_space<vmem>>, vector<128x128xf32>
    %cst_14 = arith.constant dense<0.000000e+00> : vector<8x128xf32>
    %25 = tpu.matmul %23, %24, %cst_14 {dimension_numbers = #tpu.dot_dimension_numbers<[1], [0], [0], [1], [0, 0, 1, 1], [], []>} : vector<8x128xf32>, vector<128x128xf32>, vector<8x128xf32> -> vector<8x128xf32>
    %c2 = arith.constant 2 : index
    %c0_15 = arith.constant 0 : index
    %26 = vector.load %arg7[%c2, %c0_15] : memref<3x128xf32, #tpu.memory_space<vmem>>, vector<1x128xf32>
    %27 = vector.broadcast %26 : vector<1x128xf32> to vector<8x128xf32>
    %28 = arith.addf %25, %27 : vector<8x128xf32>
    %cst_16 = arith.constant 0.000000e+00 : f32
    %29 = vector.broadcast %cst_16 : f32 to vector<8x128xf32>
    %30 = arith.maximumf %28, %29 : vector<8x128xf32>
    %c0_17 = arith.constant 0 : index
    %c0_18 = arith.constant 0 : index
    %31 = vector.load %arg5[%c0_17, %c0_18] : memref<128x2xf32, #tpu.memory_space<vmem>>, vector<128x2xf32>
    %cst_19 = arith.constant dense<0.000000e+00> : vector<8x2xf32>
    %32 = tpu.matmul %30, %31, %cst_19 {dimension_numbers = #tpu.dot_dimension_numbers<[1], [0], [0], [1], [0, 0, 1, 1], [], []>} : vector<8x128xf32>, vector<128x2xf32>, vector<8x2xf32> -> vector<8x2xf32>
    %c0_20 = arith.constant 0 : index
    %c0_21 = arith.constant 0 : index
    %33 = vector.load %arg8[%c0_20, %c0_21] : memref<2x2xf32, #tpu.memory_space<vmem>>, vector<1x2xf32>
    %34 = vector.broadcast %33 : vector<1x2xf32> to vector<8x2xf32>
    %35 = arith.addf %32, %34 : vector<8x2xf32>
    %c0_22 = arith.constant 0 : index
    %c0_23 = arith.constant 0 : index
    %36 = vector.load %arg9[%c0_22, %c0_23] : memref<8x2xf32, #tpu.memory_space<vmem>>, vector<8x2xf32>
    tpu.vector_store %arg9[%c0_22, %c0_23], %35 {strides = array<i32>} : memref<8x2xf32, #tpu.memory_space<vmem>>, vector<8x2xf32>,
    %c0_24 = arith.constant 0 : index
    %c0_25 = arith.constant 0 : index
    %37 = vector.load %arg6[%c0_24, %c0_25] : memref<128x2xf32, #tpu.memory_space<vmem>>, vector<128x2xf32>
    %cst_26 = arith.constant dense<0.000000e+00> : vector<8x2xf32>
    %38 = tpu.matmul %30, %37, %cst_26 {dimension_numbers = #tpu.dot_dimension_numbers<[1], [0], [0], [1], [0, 0, 1, 1], [], []>} : vector<8x128xf32>, vector<128x2xf32>, vector<8x2xf32> -> vector<8x2xf32>
    %c1_27 = arith.constant 1 : index
    %c0_28 = arith.constant 0 : index
    %39 = vector.load %arg8[%c1_27, %c0_28] : memref<2x2xf32, #tpu.memory_space<vmem>>, vector<1x2xf32>
    %40 = vector.broadcast %39 : vector<1x2xf32> to vector<8x2xf32>
    %41 = arith.addf %38, %40 : vector<8x2xf32>
    %c0_29 = arith.constant 0 : index
    %c0_30 = arith.constant 0 : index
    %42 = vector.load %arg10[%c0_29, %c0_30] : memref<8x2xf32, #tpu.memory_space<vmem>>, vector<8x2xf32>
    tpu.vector_store %arg10[%c0_29, %c0_30], %41 {strides = array<i32>} : memref<8x2xf32, #tpu.memory_space<vmem>>, vector<8x2xf32>,
    return
  }
  func.func @transform_0(%arg0: i32) -> (i32, i32) {
    %c0_i32 = arith.constant 0 : i32
    %c0_i32_0 = arith.constant 0 : i32
    return %arg0, %c0_i32 : i32, i32
  }
  func.func @transform_1(%arg0: i32) -> (i32, i32) {
    %c0_i32 = arith.constant 0 : i32
    %c0_i32_0 = arith.constant 0 : i32
    %c0_i32_1 = arith.constant 0 : i32
    return %c0_i32, %c0_i32_0 : i32, i32
  }
  func.func @transform_2(%arg0: i32) -> (i32, i32) {
    %c0_i32 = arith.constant 0 : i32
    %c0_i32_0 = arith.constant 0 : i32
    %c0_i32_1 = arith.constant 0 : i32
    return %c0_i32, %c0_i32_0 : i32, i32
  }
  func.func @transform_3(%arg0: i32) -> (i32, i32) {
    %c0_i32 = arith.constant 0 : i32
    %c0_i32_0 = arith.constant 0 : i32
    %c0_i32_1 = arith.constant 0 : i32
    return %c0_i32, %c0_i32_0 : i32, i32
  }
  func.func @transform_4(%arg0: i32) -> (i32, i32) {
    %c0_i32 = arith.constant 0 : i32
    %c0_i32_0 = arith.constant 0 : i32
    %c0_i32_1 = arith.constant 0 : i32
    return %c0_i32, %c0_i32_0 : i32, i32
  }
  func.func @transform_5(%arg0: i32) -> (i32, i32) {
    %c0_i32 = arith.constant 0 : i32
    %c0_i32_0 = arith.constant 0 : i32
    %c0_i32_1 = arith.constant 0 : i32
    return %c0_i32, %c0_i32_0 : i32, i32
  }
  func.func @transform_6(%arg0: i32) -> (i32, i32) {
    %c0_i32 = arith.constant 0 : i32
    %c0_i32_0 = arith.constant 0 : i32
    %c0_i32_1 = arith.constant 0 : i32
    return %c0_i32, %c0_i32_0 : i32, i32
  }
  func.func @transform_7(%arg0: i32) -> (i32, i32) {
    %c0_i32 = arith.constant 0 : i32
    %c0_i32_0 = arith.constant 0 : i32
    %c0_i32_1 = arith.constant 0 : i32
    return %c0_i32, %c0_i32_0 : i32, i32
  }
  func.func @transform_8(%arg0: i32) -> (i32, i32) {
    %c0_i32 = arith.constant 0 : i32
    %c0_i32_0 = arith.constant 0 : i32
    return %arg0, %c0_i32 : i32, i32
  }
  func.func @transform_9(%arg0: i32) -> (i32, i32) {
    %c0_i32 = arith.constant 0 : i32
    %c0_i32_0 = arith.constant 0 : i32
    return %arg0, %c0_i32 : i32, i32
  }
}

</mosaic_0001>

<bundles_post_ra>
// kernel: tpu_custom_call.1
= control target key start
LH: loop header
LB: loop body
LE: loop exit
PB: predicated region body
PF: predicated region fallthrough
CT: control target
= control target key end

     0   :  { %v228_v0 = vmov 0   ;;  %v229_v8 = vmov 1   ;;  %vm168_vm0 = vcmask 15360   ;;  %s502_s0 = inlined_call_operand.vmem [shape: f32[8,2], index: 0, kind: input, shape index: {}]   ;;  %s503_s2 = inlined_call_operand.vmem [shape: f32[128,128], index: 2, kind: input, shape index: {}]   ;;  %s504_s1 = inlined_call_operand.vmem [shape: f32[2,128], index: 1, kind: input, shape index: {}]   ;;  %s505_s6 = inlined_call_operand.vmem [shape: f32[3,128], index: 6, kind: input, shape index: {}]   ;;  %s506_s3 = inlined_call_operand.vmem [shape: f32[128,128], index: 3, kind: input, shape index: {}]   ;;  %s507_s4 = inlined_call_operand.vmem [shape: f32[128,2], index: 4, kind: input, shape index: {}]   ;;  %s508_s5 = inlined_call_operand.vmem [shape: f32[128,2], index: 5, kind: input, shape index: {}]   ;;  %s509_s7 = inlined_call_operand.vmem [shape: f32[2,2], index: 7, kind: input, shape index: {}]   ;;  %s510_s8 = inlined_call_operand.vmem [shape: f32[8,2], index: 8, kind: output, shape index: {0}]   ;;  %s511_s9 = inlined_call_operand.vmem [shape: f32[8,2], index: 9, kind: output, shape index: {1}]  }
   0x1   :  { %219 = vset.pattern.permute.xlu0 %v228_v0  ;;  %v31_v1 = vld [vmem:[%s502_s0] sm:$0xff]  ;;  %v67_v2 = vld [vmem:[%s503_s2 + $0x78] sm:$0xff]  ;;  %v66_v3 = vld [vmem:[%s503_s2 + $0x70] sm:$0xff] }
   0x2   :  { %35 = vperm.xlu0 %219, %v31_v1   ;;  %70 = vmatpush.msra.mxu0 %v67_v2  ;;  %v65_v4 = vld [vmem:[%s503_s2 + $0x68] sm:$0xff]  ;;  %v64_v5 = vld [vmem:[%s503_s2 + $0x60] sm:$0xff]  ;;  %v63_v6 = vld [vmem:[%s503_s2 + $0x58] sm:$0xff] }
   0x3   :  { %v62_v7 = vld [vmem:[%s503_s2 + $0x50] sm:$0xff]  ;;  %v61_v9 = vld [vmem:[%s503_s2 + $0x48] sm:$0xff]  ;;  %v60_v10 = vld [vmem:[%s503_s2 + $0x40] sm:$0xff] }
   0x4   :  { %71 = vmatpush.msra.mxu0 %v66_v3  ;;  %v59_v11 = vld [vmem:[%s503_s2 + $0x38] sm:$0xff]  ;;  %v58_v12 = vld [vmem:[%s503_s2 + $0x30] sm:$0xff]  ;;  %v57_v13 = vld [vmem:[%s503_s2 + $0x28] sm:$0xff] }
   0x5   :  { %v56_v14 = vld [vmem:[%s503_s2 + $0x20] sm:$0xff]  ;;  %v55_v15 = vld [vmem:[%s503_s2 + $0x18] sm:$0xff]  ;;  %v54_v16 = vld [vmem:[%s503_s2 + $0x10] sm:$0xff] }
   0x6   :  { %72 = vmatpush.msra.mxu0 %v65_v4  ;;  %v53_v17 = vld [vmem:[%s503_s2 + $0x8] sm:$0xff]  ;;  %v52_v18 = vld [vmem:[%s503_s2] sm:$0xff]  ;;  %v106_v19 = vld [vmem:[%s506_s3 + $0x78] sm:$0xff] }
   0x7   :  { %v105_v20 = vld [vmem:[%s506_s3 + $0x70] sm:$0xff]  ;;  %109 = vmatpush.msra.mxu1 %v106_v19  ;;  %v104_v21 = vld [vmem:[%s506_s3 + $0x68] sm:$0xff]  ;;  %v103_v22 = vld [vmem:[%s506_s3 + $0x60] sm:$0xff] }
   0x8   :  { %73 = vmatpush.msra.mxu0 %v64_v5  ;;  %v102_v23 = vld [vmem:[%s506_s3 + $0x58] sm:$0xff]  ;;  %v101_v24 = vld [vmem:[%s506_s3 + $0x50] sm:$0xff]  ;;  %v100_v25 = vld [vmem:[%s506_s3 + $0x48] sm:$0xff] }
   0x9   :  { %110 = vmatpush.msra.mxu1 %v105_v20  ;;  %v99_v26 = vld [vmem:[%s506_s3 + $0x40] sm:$0xff]  ;;  %v98_v28 = vld [vmem:[%s506_s3 + $0x38] sm:$0xff]  ;;  %v97_v29 = vld [vmem:[%s506_s3 + $0x30] sm:$0xff] }
   0xa   :  { %220 = vset.pattern.permute.xlu0 %v229_v8  ;;  %74 = vmatpush.msra.mxu0 %v63_v6  ;;  %v96_v30 = vld [vmem:[%s506_s3 + $0x28] sm:$0xff]  ;;  %v221_v31 = vld [vmem:[%s504_s1] ss:$0 sm:$0xff]  ;;  %v222_v32 = vld [vmem:[%s504_s1 + $0x1] ss:$0 sm:$0xff] }
   0xb   :  { %42 = vperm.xlu0 %220, %v31_v1   ;;  %111 = vmatpush.msra.mxu1 %v104_v21  ;;  %v95_v33 = vld [vmem:[%s506_s3 + $0x20] sm:$0xff]  ;;  %v94_v34 = vld [vmem:[%s506_s3 + $0x18] sm:$0xff]  ;;  %v93_v42 = vld [vmem:[%s506_s3 + $0x10] sm:$0xff] }
   0xc   :  { %75 = vmatpush.msra.mxu0 %v62_v7  ;;  %v223_v38 = vld [vmem:[%s505_s6] ss:$0 sm:$0xff]  ;;  %v92_v43 = vld [vmem:[%s506_s3 + $0x8] sm:$0xff]  ;;  %v145_v45 = vld [vmem:[%s507_s4 + $0x78] sm:$0xff] }
   0xd   :  { %112 = vmatpush.msra.mxu1 %v103_v22  ;;  %v91_v44 = vld [vmem:[%s506_s3] sm:$0xff]  ;;  %v185_v46 = vld [vmem:[%s508_s5 + $0x78] sm:$0xff]  ;;  %v144_v47 = vld [vmem:[%s507_s4 + $0x70] sm:$0xff]  ;;  %148 = vmatpush.msra.mxu2 %v145_v45 }
   0xe   :  { %76 = vmatpush.msra.mxu0 %v61_v9  ;;  %188 = vmatpush.msra.mxu3 %v185_v46  ;;  %v184_v48 = vld [vmem:[%s508_s5 + $0x70] sm:$0xff]  ;;  %v143_v49 = vld [vmem:[%s507_s4 + $0x68] sm:$0xff]  ;;  %v142_v51 = vld [vmem:[%s507_s4 + $0x60] sm:$0xff] }
   0xf   :  { %113 = vmatpush.msra.mxu1 %v102_v23  ;;  %v183_v50 = vld [vmem:[%s508_s5 + $0x68] sm:$0xff]  ;;  %149 = vmatpush.msra.mxu2 %v144_v47  ;;  %v182_v52 = vld [vmem:[%s508_s5 + $0x60] sm:$0xff]  ;;  %v141_v53 = vld [vmem:[%s507_s4 + $0x58] sm:$0xff] }
  0x10   :  { %77 = vmatpush.msra.mxu0 %v60_v10  ;;  %189 = vmatpush.msra.mxu3 %v184_v48  ;;  %v181_v54 = vld [vmem:[%s508_s5 + $0x58] sm:$0xff]  ;;  %v140_v55 = vld [vmem:[%s507_s4 + $0x50] sm:$0xff]  ;;  %v139_v57 = vld [vmem:[%s507_s4 + $0x48] sm:$0xff] }
  0x11   :  { %114 = vmatpush.msra.mxu1 %v101_v24  ;;  %150 = vmatpush.msra.mxu2 %v143_v49  ;;  %v180_v56 = vld [vmem:[%s508_s5 + $0x50] sm:$0xff]  ;;  %v179_v58 = vld [vmem:[%s508_s5 + $0x48] sm:$0xff]  ;;  %v138_v59 = vld [vmem:[%s507_s4 + $0x40] sm:$0xff] }
  0x12   :  { %78 = vmatpush.msra.mxu0 %v59_v11  ;;  %190 = vmatpush.msra.mxu3 %v183_v50  ;;  %v178_v60 = vld [vmem:[%s508_s5 + $0x40] sm:$0xff]  ;;  %v137_v61 = vld [vmem:[%s507_s4 + $0x38] sm:$0xff]  ;;  %v136_v63 = vld [vmem:[%s507_s4 + $0x30] sm:$0xff] }
  0x13   :  { %115 = vmatpush.msra.mxu1 %v100_v25  ;;  %151 = vmatpush.msra.mxu2 %v142_v51  ;;  %v177_v62 = vld [vmem:[%s508_s5 + $0x38] sm:$0xff]  ;;  %v176_v0 = vld [vmem:[%s508_s5 + $0x30] sm:$0xff]  ;;  %v135_v1 = vld [vmem:[%s507_s4 + $0x28] sm:$0xff] }
  0x14   :  { %79 = vmatpush.msra.mxu0 %v58_v12  ;;  %191 = vmatpush.msra.mxu3 %v182_v52  ;;  %v175_v2 = vld [vmem:[%s508_s5 + $0x28] sm:$0xff]  ;;  %v134_v3 = vld [vmem:[%s507_s4 + $0x20] sm:$0xff]  ;;  %v133_v5 = vld [vmem:[%s507_s4 + $0x18] sm:$0xff] }
  0x15   :  { %116 = vmatpush.msra.mxu1 %v99_v26  ;;  %152 = vmatpush.msra.mxu2 %v141_v53  ;;  %v174_v4 = vld [vmem:[%s508_s5 + $0x20] sm:$0xff]  ;;  %v173_v6 = vld [vmem:[%s508_s5 + $0x18] sm:$0xff]  ;;  %v132_v11 = vld [vmem:[%s507_s4 + $0x10] sm:$0xff] }
  0x16   :  { %80 = vmatpush.msra.mxu0 %v57_v13  ;;  %192 = vmatpush.msra.mxu3 %v181_v54  ;;  %v224_v7 = vld [vmem:[%s505_s6 + $0x1] ss:$0 sm:$0xff]  ;;  %v172_v12 = vld [vmem:[%s508_s5 + $0x10] sm:$0xff]  ;;  %v131_v13 = vld [vmem:[%s507_s4 + $0x8] sm:$0xff] }
  0x17   :  { %117 = vmatpush.msra.mxu1 %v98_v28  ;;  %153 = vmatpush.msra.mxu2 %v140_v55  ;;  %v226_v21 = vld [vmem:[%s509_s7] ss:$0 sm:$0xff]  ;;  %v227_v22 = vld [vmem:[%s509_s7 + $0x1] ss:$0 sm:$0xff] }
  0x18   :  { %81 = vmatpush.msra.mxu0 %v56_v14  ;;  %193 = vmatpush.msra.mxu3 %v180_v56  ;;  %v171_v14 = vld [vmem:[%s508_s5 + $0x8] sm:$0xff] }
  0x19   :  { %118 = vmatpush.msra.mxu1 %v97_v29  ;;  %154 = vmatpush.msra.mxu2 %v139_v57 }
  0x1a   :  { %82 = vmatpush.msra.mxu0 %v55_v15  ;;  %194 = vmatpush.msra.mxu3 %v179_v58  ;;  %v130_v15 = vld [vmem:[%s507_s4] sm:$0xff] }
  0x1b   :  { %119 = vmatpush.msra.mxu1 %v96_v30  ;;  %155 = vmatpush.msra.mxu2 %v138_v59 }
  0x1c   :  { %83 = vmatpush.msra.mxu0 %v54_v16  ;;  %195 = vmatpush.msra.mxu3 %v178_v60  ;;  %v170_v16 = vld [vmem:[%s508_s5] sm:$0xff] }
  0x1d   :  { %120 = vmatpush.msra.mxu1 %v95_v33  ;;  %156 = vmatpush.msra.mxu2 %v137_v61 }
  0x1e   :  { %84 = vmatpush.msra.mxu0 %v53_v17  ;;  %196 = vmatpush.msra.mxu3 %v177_v62  ;;  %v225_v17 = vld [vmem:[%s505_s6 + $0x2] ss:$0 sm:$0xff] }
  0x1f   :  { %121 = vmatpush.msra.mxu1 %v94_v34  ;;  %157 = vmatpush.msra.mxu2 %v136_v63 }
  0x20   :  { %85 = vmatpush.msra.mxu0 %v52_v18  ;;  %197 = vmatpush.msra.mxu3 %v176_v0 }
  0x21   :  { %122 = vmatpush.msra.mxu1 %v93_v42  ;;  %158 = vmatpush.msra.mxu2 %v135_v1 }
  0x22   :  { %198 = vmatpush.msra.mxu3 %v175_v2 }
  0x23   :  { %123 = vmatpush.msra.mxu1 %v92_v43  ;;  %159 = vmatpush.msra.mxu2 %v134_v3 }
  0x24   :  { %199 = vmatpush.msra.mxu3 %v174_v4 }
  0x25   :  { %124 = vmatpush.msra.mxu1 %v91_v44  ;;  %160 = vmatpush.msra.mxu2 %v133_v5 }
  0x26   :  { %200 = vmatpush.msra.mxu3 %v173_v6 }
  0x27   :  { %161 = vmatpush.msra.mxu2 %v132_v11 }
  0x28   :  { %201 = vmatpush.msra.mxu3 %v172_v12 }
  0x29   :  { %162 = vmatpush.msra.mxu2 %v131_v13 }
  0x2a   :  { %202 = vmatpush.msra.mxu3 %v171_v14 }
  0x2b   :  { %163 = vmatpush.msra.mxu2 %v130_v15 }
  0x2c   :  { %203 = vmatpush.msra.mxu3 %v170_v16 }
  0x74   :  { %v36_v27 = vpop.permute.xlu0 %35 }
  0x75   :  { %v39_v36 = vmul.f32 %v221_v31, %v36_v27 }
  0x7d   :  { %v43_v35 = vpop.permute.xlu0 %42 }
  0x7e   :  { %v46_v37 = vmul.f32 %v222_v32, %v43_v35 }
  0x80   :  { %v47_v39 = vadd.f32 %v46_v37, %v39_v36 }
  0x82   :  { %v50_v40 = vadd.f32 %v223_v38, %v47_v39 }
  0x84   :  { %v51_v41 = vmax.f32 %v50_v40, 0.0 }
  0x86   :  { %86 = vmatmul.f32.vlgmr.msra.gmra.mxu0 %v51_v41 }
 0x103   :  { %v87_v8 = vpop.f32.mrf.mxu0 }
 0x104   :  { %v88_v9 = vadd.f32 %v224_v7, %v87_v8 }
 0x106   :  { %v90_v10 = vmax.f32 %v88_v9, 0.0 }
 0x108   :  { %125 = vmatmul.f32.vlgmr.msra.gmra.mxu1 %v90_v10 }
 0x185   :  { %v126_v18 = vpop.f32.mrf.mxu1 }
 0x186   :  { %v127_v19 = vadd.f32 %v225_v17, %v126_v18 }
 0x188   :  { %v129_v20 = vmax.f32 %v127_v19, 0.0 }
 0x18a   :  { %164 = vmatmul.f32.vlgmr.msra.gmra.mxu2 %v129_v20  ;;  %204 = vmatmul.f32.vlgmr.msra.gmra.mxu3 %v129_v20 }
 0x20d   :  { %v165_v23 = vpop.f32.mrf.mxu2  ;;  %v205_v24 = vpop.f32.mrf.mxu3 }
 0x20e   :  { %v166_v25 = vadd.f32 %v226_v21, %v165_v23  ;;  %v206_v26 = vadd.f32 %v227_v22, %v205_v24 }
 0x210   :  { %169 = vst.msk [vmem:[%s510_s8] sm:$0xff] %vm168_vm0, %v166_v25 }
 0x211   :  { %208 = vst.msk [vmem:[%s511_s9] sm:$0xff] %vm168_vm0, %v206_v26 }

</bundles_post_ra>
